<compile_context>
chip_gen: v6e
topology: v6e:2x2x1
jax: 0.10.0
libtpu: 0.0.40
codegen_flags: <defaults>
</compile_context>

<pallas_src>
import functools

import jax
import jax.numpy as jnp
from jax.experimental import pallas as pl
from jax.experimental.pallas import tpu as pltpu

_LANE = 128                       # lane-dense feature padding
_TM_MAX = 256                     # max dst-row tile
_TK_MAX = 512                     # max src-row (reduction) tile
_VMEM_LIMIT = 32 * 1024 * 1024    # raises v5e's 16 MiB scoped default; fits v7x 64 MiB


def _round_up(x, m):
    return (x + m - 1) // m * m


def _pad2d(x, rows, cols):
    """Slice / zero-pad a 2-D array to exactly (rows, cols)."""
    r, c = x.shape
    if r < rows or c < cols:
        x = jnp.pad(x, ((0, max(0, rows - r)), (0, max(0, cols - c))))
    return x[:rows, :cols]


def _gcn_layer_kernel(a_ref, hs_ref, hd_ref, wd_ref, wn_ref, b_ref, o_ref,
                      acc_ref, *, fold_wn):
    """One MyGraphConv layer. Grid = (dst tile i, src reduction tile k).

    acc accumulates A@h (or A@(h@Wn) when fold_wn) in f32; the epilogue on the
    last k step applies the dst-path matmul, bias and ReLU in f32.
    """
    k = pl.program_id(1)

    @pl.when(k == 0)
    def _():
        acc_ref[...] = jnp.zeros_like(acc_ref)

    if fold_wn:
        # A @ (h @ Wn): runs the big Ndst*Nsrc contraction at width Fout < Fin.
        hw = jnp.dot(hs_ref[...], wn_ref[...],
                     preferred_element_type=jnp.float32).astype(jnp.bfloat16)
        acc_ref[...] += jnp.dot(a_ref[...], hw,
                                preferred_element_type=jnp.float32)
    else:
        acc_ref[...] += jnp.dot(a_ref[...], hs_ref[...],
                                preferred_element_type=jnp.float32)

    @pl.when(k == pl.num_programs(1) - 1)
    def _():
        if fold_wn:
            neigh = acc_ref[...]                                  # (tm, Fout_p) f32
        else:
            neigh = jnp.dot(acc_ref[...].astype(jnp.bfloat16), wn_ref[...],
                            preferred_element_type=jnp.float32)   # (tm, Fout_p) f32
        out = (jnp.dot(hd_ref[...], wd_ref[...],
                       preferred_element_type=jnp.float32)
               + neigh + b_ref[...])                              # f32 epilogue
        o_ref[...] = jnp.maximum(out, 0.0).astype(o_ref.dtype)    # F.relu


def _gcn_layer(a, h, wd, wn, bias, n_dst, n_src):
    """a: (n_dst, n_src) bf16 row-normalized adjacency (unpadded),
       h: (>= n_src rows, f_in_p) bf16 (feature dim already lane-padded),
       wd/wn: (f_in_p, f_out_p) bf16, bias: (1, f_out_p) f32.
       Returns (n_dst_p, f_out_p) bf16 (padded rows/cols are junk/zero)."""
    assert n_dst <= n_src, "DGL blocks: dst nodes must be a prefix of src nodes"
    f_in_p, f_out_p = wd.shape

    # bf16 packs 2 rows per sublane -> keep row tiles multiples of 16.
    tm = min(_TM_MAX, _round_up(n_dst, 16))
    tk = min(_TK_MAX, _round_up(n_src, 16))
    n_dst_p = _round_up(n_dst, tm)
    n_src_p = _round_up(n_src, tk)
    h_rows_p = max(n_src_p, n_dst_p)   # dst-prefix tiles must stay in range

    a_p = _pad2d(a, n_dst_p, n_src_p)        # zero cols beyond n_src => no contribution
    h_p = _pad2d(h, h_rows_p, f_in_p)

    fold_wn = f_out_p < f_in_p               # reassociate for narrow outputs
    acc_cols = f_out_p if fold_wn else f_in_p

    grid = (n_dst_p // tm, n_src_p // tk)

    flops = 2 * n_dst_p * n_src_p * acc_cols + 4 * n_dst_p * f_in_p * f_out_p
    bytes_accessed = (a_p.size * 2 + h_p.size * 2 + wd.size * 2 + wn.size * 2
                      + bias.size * 4 + n_dst_p * f_out_p * 2)

    kernel = functools.partial(_gcn_layer_kernel, fold_wn=fold_wn)
    return pl.pallas_call(
        kernel,
        out_shape=jax.ShapeDtypeStruct((n_dst_p, f_out_p), jnp.bfloat16),
        grid_spec=pltpu.PrefetchScalarGridSpec(
            num_scalar_prefetch=0,
            grid=grid,
            in_specs=[
                pl.BlockSpec((tm, tk), lambda i, k: (i, k)),          # A tile
                pl.BlockSpec((tk, f_in_p), lambda i, k: (k, 0)),      # h src tile
                pl.BlockSpec((tm, f_in_p), lambda i, k: (i, 0)),      # h dst tile
                pl.BlockSpec((f_in_p, f_out_p), lambda i, k: (0, 0)),  # W_dst
                pl.BlockSpec((f_in_p, f_out_p), lambda i, k: (0, 0)),  # W_neigh
                pl.BlockSpec((1, f_out_p), lambda i, k: (0, 0)),       # bias (f32)
            ],
            out_specs=pl.BlockSpec((tm, f_out_p), lambda i, k: (i, 0)),
            scratch_shapes=[pltpu.VMEM((tm, acc_cols), jnp.float32)],
        ),
        compiler_params=pltpu.CompilerParams(
            dimension_semantics=("parallel", "arbitrary"),
            vmem_limit_bytes=_VMEM_LIMIT,
        ),
        cost_estimate=pl.CostEstimate(
            flops=flops, transcendentals=0, bytes_accessed=bytes_accessed),
    )(a_p, h_p, h_p, wd, wn, bias)


def prepare_params(params):
    """One-time repack of torch nn.Linear(2*Fin, Fout) params.

    Splits W into W_dst / W_neigh, transposes to (Fin, Fout), zero-pads both
    feature dims to lane-dense multiples of 128, casts to bf16 (bias stays
    f32). Returns per-layer (wd, wn, bias, f_in, f_out)."""
    packed = []
    for w, b in params:
        f_out, two_fin = w.shape
        f_in = two_fin // 2
        f_in_p = _round_up(f_in, _LANE)
        f_out_p = _round_up(f_out, _LANE)
        w = jnp.asarray(w, jnp.float32)
        wd = _pad2d(jnp.transpose(w[:, :f_in]), f_in_p, f_out_p).astype(jnp.bfloat16)
        wn = _pad2d(jnp.transpose(w[:, f_in:]), f_in_p, f_out_p).astype(jnp.bfloat16)
        bias = _pad2d(jnp.asarray(b, jnp.float32).reshape(1, f_out), 1, f_out_p)
        packed.append((wd, wn, bias, f_in, f_out))
    return packed


def my_gcn_forward(blocks, prepared_params, h):
    """Forward over all MyGraphConv layers (one tiled pallas_call per layer).

    blocks: list of (Ndst_i, Nsrc_i) row-normalized dense adjacency matrices
    prepared_params: output of prepare_params()
    h: (Nsrc_0, Fin_0) input node features
    """
    n_layers = len(prepared_params)
    assert len(blocks) == n_layers, \
        "Numbers of blocks and layers should be equal"
    assert blocks[0].shape[1] == h.shape[0], \
        "Number of src nodes should be equal to number of features(h)"
    assert h.shape[1] == prepared_params[0][3]

    # Cast once to bf16 and lane-pad the feature dim; intermediates stay bf16
    # (halves HBM bytes for the layer-to-layer round trip).
    h_p = _pad2d(jnp.asarray(h, jnp.bfloat16),
                 h.shape[0], _round_up(h.shape[1], _LANE))

    n_dst_last = None
    for a, (wd, wn, bias, f_in, f_out) in zip(blocks, prepared_params):
        n_dst, n_src = int(a.shape[0]), int(a.shape[1])
        h_p = _gcn_layer(jnp.asarray(a, jnp.bfloat16), h_p, wd, wn, bias,
                         n_dst, n_src)
        n_dst_last = n_dst

    f_out_last = prepared_params[-1][4]
    # Strip node-row and lane padding; return f32 like the PyTorch module.
    return h_p[:n_dst_last, :f_out_last].astype(jnp.float32)


def _reference_forward(blocks, params, h):
    """Pure-JAX f32 reference mirroring the PyTorch module."""
    for a, (w, b) in zip(blocks, params):
        n_dst = a.shape[0]
        h_dst = h[:n_dst]
        h_neigh = a @ h
        x = jnp.concatenate([h_dst, h_neigh], axis=1)
        h = jnp.maximum(x @ w.T + b, 0.0)
    return h


if __name__ == "__main__":
    key = jax.random.PRNGKey(0)

    # MyGCN(in_feats, n_hidden, n_classes, n_layers) -> n_layers + 1 MyGraphConv layers
    in_feats, n_hidden, n_classes, n_layers = 16, 32, 8, 2
    layer_dims = ([(in_feats, n_hidden)]
                  + [(n_hidden, n_hidden)] * (n_layers - 1)
                  + [(n_hidden, n_classes)])
    num_layers = len(layer_dims)                               # 3

    # block i: src nodes = node_counts[i], dst nodes = node_counts[i+1]
    # (dst nodes are a prefix of src nodes, as in DGL blocks)
    node_counts = [32, 16, 8, 8]
    assert len(node_counts) == num_layers + 1

    keys = jax.random.split(key, 1 + 2 * num_layers)
    h = jax.random.normal(keys[0], (node_counts[0], in_feats), jnp.float32)

    # Synthetic DGL blocks as row-normalized dense adjacency matrices.
    blocks = []
    for i in range(num_layers):
        n_src, n_dst = node_counts[i], node_counts[i + 1]
        adj = (jax.random.uniform(keys[1 + i], (n_dst, n_src)) < 0.3).astype(jnp.float32)
        # ensure every dst node has >= 1 neighbor (dst nodes are first n_dst src nodes)
        adj = jnp.maximum(adj, jnp.eye(n_dst, n_src, dtype=jnp.float32))
        deg = jnp.maximum(adj.sum(axis=1, keepdims=True), 1.0)  # deg==0 guard
        blocks.append(adj / deg)

    # Deterministic parameter init, torch nn.Linear(2*in, out) layout.
    params = []
    for li, (fi, fo) in enumerate(layer_dims):
        wk, bk = jax.random.split(keys[1 + num_layers + li])
        bound = 1.0 / jnp.sqrt(2.0 * fi)
        w = jax.random.uniform(wk, (fo, 2 * fi), jnp.float32, -bound, bound)
        b = jax.random.uniform(bk, (fo,), jnp.float32, -bound, bound)
        params.append((w, b))

    # One-time weight repack (split/transpose/pad/cast, outside the fwd path).
    prepared = prepare_params(params)

    out = my_gcn_forward(blocks, prepared, h)
    out = jax.block_until_ready(out)

    assert out.shape == (node_counts[-1], n_classes)
    assert bool(jnp.all(jnp.isfinite(out)))

    # Correctness vs. pure-JAX f32 reference (bf16 MXU inputs -> loose tol).
    ref = _reference_forward(blocks, params, h)
    assert bool(jnp.allclose(out, ref, atol=5e-2, rtol=5e-2)), "mismatch vs reference"

    print("KERNEL_OK")
</pallas_src>

<mosaic_0001>
module attributes {stable_mosaic.version = 11 : i64} {
  func.func @_gcn_layer_kernel(%arg0: i32, %arg1: i32, %arg2: memref<16x32xbf16, #tpu.memory_space<vmem>>, %arg3: memref<32x128xbf16, #tpu.memory_space<vmem>>, %arg4: memref<16x128xbf16, #tpu.memory_space<vmem>>, %arg5: memref<128x128xbf16, #tpu.memory_space<vmem>>, %arg6: memref<128x128xbf16, #tpu.memory_space<vmem>>, %arg7: memref<1x128xf32, #tpu.memory_space<vmem>>, %arg8: memref<16x128xbf16, #tpu.memory_space<vmem>>, %arg9: memref<16x128xf32, #tpu.memory_space<vmem>>) attributes {dimension_semantics = [#tpu.dimension_semantics<parallel>, #tpu.dimension_semantics<arbitrary>], iteration_bounds = array<i64: 1, 1>, scalar_prefetch = 0 : i64, scratch_operands = 1 : i64, tpu.core_type = #tpu.core_type<tc>, window_params = [{transform_indices = @transform_0, window_bounds = array<i64: 16, 32>}, {transform_indices = @transform_1, window_bounds = array<i64: 32, 128>}, {transform_indices = @transform_2, window_bounds = array<i64: 16, 128>}, {pipeline_mode = #tpu.pipeline_mode<synchronous>, transform_indices = @transform_3, window_bounds = array<i64: 128, 128>}, {pipeline_mode = #tpu.pipeline_mode<synchronous>, transform_indices = @transform_4, window_bounds = array<i64: 128, 128>}, {pipeline_mode = #tpu.pipeline_mode<synchronous>, transform_indices = @transform_5, window_bounds = array<i64: 1, 128>}, {transform_indices = @transform_6, window_bounds = array<i64: 16, 128>}]} {
    %c0_i32 = arith.constant 0 : i32
    %0 = arith.cmpi eq, %arg1, %c0_i32 : i32
    %1 = arith.extui %0 : i1 to i32
    %c0_i32_0 = arith.constant 0 : i32
    %2 = arith.cmpi ne, %1, %c0_i32_0 : i32
    scf.if %2 {
      %cst_10 = arith.constant 0.000000e+00 : f32
      %12 = vector.broadcast %cst_10 : f32 to vector<16x128xf32>
      %c0_11 = arith.constant 0 : index
      %c0_12 = arith.constant 0 : index
      %13 = vector.load %arg9[%c0_11, %c0_12] : memref<16x128xf32, #tpu.memory_space<vmem>>, vector<16x128xf32>
      tpu.vector_store %arg9[%c0_11, %c0_12], %12 {strides = array<i32>} : memref<16x128xf32, #tpu.memory_space<vmem>>, vector<16x128xf32>,
    } else {
    }
    %c0 = arith.constant 0 : index
    %c0_1 = arith.constant 0 : index
    %3 = vector.load %arg9[%c0, %c0_1] : memref<16x128xf32, #tpu.memory_space<vmem>>, vector<16x128xf32>
    %c0_2 = arith.constant 0 : index
    %c0_3 = arith.constant 0 : index
    %4 = vector.load %arg2[%c0_2, %c0_3] : memref<16x32xbf16, #tpu.memory_space<vmem>>, vector<16x32xbf16>
    %c0_4 = arith.constant 0 : index
    %c0_5 = arith.constant 0 : index
    %5 = vector.load %arg3[%c0_4, %c0_5] : memref<32x128xbf16, #tpu.memory_space<vmem>>, vector<32x128xbf16>
    %cst = arith.constant dense<0.000000e+00> : vector<16x128xf32>
    %6 = tpu.matmul %4, %5, %cst {dimension_numbers = #tpu.dot_dimension_numbers<[1], [0], [0], [1], [0, 0, 1, 1], [], []>} : vector<16x32xbf16>, vector<32x128xbf16>, vector<16x128xf32> -> vector<16x128xf32>
    %7 = arith.addf %3, %6 : vector<16x128xf32>
    %c0_6 = arith.constant 0 : index
    %c0_7 = arith.constant 0 : index
    %8 = vector.load %arg9[%c0_6, %c0_7] : memref<16x128xf32, #tpu.memory_space<vmem>>, vector<16x128xf32>
    tpu.vector_store %arg9[%c0_6, %c0_7], %7 {strides = array<i32>} : memref<16x128xf32, #tpu.memory_space<vmem>>, vector<16x128xf32>,
    %c0_i32_8 = arith.constant 0 : i32
    %9 = arith.cmpi eq, %arg1, %c0_i32_8 : i32
    %10 = arith.extui %9 : i1 to i32
    %c0_i32_9 = arith.constant 0 : i32
    %11 = arith.cmpi ne, %10, %c0_i32_9 : i32
    scf.if %11 {
      %c0_10 = arith.constant 0 : index
      %c0_11 = arith.constant 0 : index
      %12 = vector.load %arg9[%c0_10, %c0_11] : memref<16x128xf32, #tpu.memory_space<vmem>>, vector<16x128xf32>
      %13 = arith.truncf %12 : vector<16x128xf32> to vector<16x128xbf16>
      %c0_12 = arith.constant 0 : index
      %c0_13 = arith.constant 0 : index
      %14 = vector.load %arg6[%c0_12, %c0_13] : memref<128x128xbf16, #tpu.memory_space<vmem>>, vector<128x128xbf16>
      %cst_14 = arith.constant dense<0.000000e+00> : vector<16x128xf32>
      %15 = tpu.matmul %13, %14, %cst_14 {dimension_numbers = #tpu.dot_dimension_numbers<[1], [0], [0], [1], [0, 0, 1, 1], [], []>} : vector<16x128xbf16>, vector<128x128xbf16>, vector<16x128xf32> -> vector<16x128xf32>
      %c0_15 = arith.constant 0 : index
      %c0_16 = arith.constant 0 : index
      %16 = vector.load %arg4[%c0_15, %c0_16] : memref<16x128xbf16, #tpu.memory_space<vmem>>, vector<16x128xbf16>
      %c0_17 = arith.constant 0 : index
      %c0_18 = arith.constant 0 : index
      %17 = vector.load %arg5[%c0_17, %c0_18] : memref<128x128xbf16, #tpu.memory_space<vmem>>, vector<128x128xbf16>
      %cst_19 = arith.constant dense<0.000000e+00> : vector<16x128xf32>
      %18 = tpu.matmul %16, %17, %cst_19 {dimension_numbers = #tpu.dot_dimension_numbers<[1], [0], [0], [1], [0, 0, 1, 1], [], []>} : vector<16x128xbf16>, vector<128x128xbf16>, vector<16x128xf32> -> vector<16x128xf32>
      %19 = arith.addf %18, %15 : vector<16x128xf32>
      %c0_20 = arith.constant 0 : index
      %c0_21 = arith.constant 0 : index
      %20 = vector.load %arg7[%c0_20, %c0_21] : memref<1x128xf32, #tpu.memory_space<vmem>>, vector<1x128xf32>
      %21 = vector.broadcast %20 : vector<1x128xf32> to vector<16x128xf32>
      %22 = arith.addf %19, %21 : vector<16x128xf32>
      %cst_22 = arith.constant 0.000000e+00 : f32
      %23 = vector.broadcast %cst_22 : f32 to vector<16x128xf32>
      %24 = arith.maximumf %22, %23 : vector<16x128xf32>
      %25 = arith.truncf %24 : vector<16x128xf32> to vector<16x128xbf16>
      %c0_23 = arith.constant 0 : index
      %c0_24 = arith.constant 0 : index
      %26 = vector.load %arg8[%c0_23, %c0_24] : memref<16x128xbf16, #tpu.memory_space<vmem>>, vector<16x128xbf16>
      tpu.vector_store %arg8[%c0_23, %c0_24], %25 {strides = array<i32>} : memref<16x128xbf16, #tpu.memory_space<vmem>>, vector<16x128xbf16>,
    } else {
    }
    return
  }
  func.func @transform_0(%arg0: i32, %arg1: i32) -> (i32, i32) {
    %c0_i32 = arith.constant 0 : i32
    return %arg0, %arg1 : i32, i32
  }
  func.func @transform_1(%arg0: i32, %arg1: i32) -> (i32, i32) {
    %c0_i32 = arith.constant 0 : i32
    %c0_i32_0 = arith.constant 0 : i32
    return %arg1, %c0_i32 : i32, i32
  }
  func.func @transform_2(%arg0: i32, %arg1: i32) -> (i32, i32) {
    %c0_i32 = arith.constant 0 : i32
    %c0_i32_0 = arith.constant 0 : i32
    return %arg0, %c0_i32 : i32, i32
  }
  func.func @transform_3(%arg0: i32, %arg1: i32) -> (i32, i32) {
    %c0_i32 = arith.constant 0 : i32
    %c0_i32_0 = arith.constant 0 : i32
    %c0_i32_1 = arith.constant 0 : i32
    return %c0_i32, %c0_i32_0 : i32, i32
  }
  func.func @transform_4(%arg0: i32, %arg1: i32) -> (i32, i32) {
    %c0_i32 = arith.constant 0 : i32
    %c0_i32_0 = arith.constant 0 : i32
    %c0_i32_1 = arith.constant 0 : i32
    return %c0_i32, %c0_i32_0 : i32, i32
  }
  func.func @transform_5(%arg0: i32, %arg1: i32) -> (i32, i32) {
    %c0_i32 = arith.constant 0 : i32
    %c0_i32_0 = arith.constant 0 : i32
    %c0_i32_1 = arith.constant 0 : i32
    return %c0_i32, %c0_i32_0 : i32, i32
  }
  func.func @transform_6(%arg0: i32, %arg1: i32) -> (i32, i32) {
    %c0_i32 = arith.constant 0 : i32
    %c0_i32_0 = arith.constant 0 : i32
    return %arg0, %c0_i32 : i32, i32
  }
}

</mosaic_0001>

<bundles_post_ra>
// kernel: tpu_custom_call.1
= control target key start
LH: loop header
LB: loop body
LE: loop exit
PB: predicated region body
PF: predicated region fallthrough
CT: control target
= control target key end

     0   :  { %11 = vsyncpa [#allocation4], 0  ;;  %s782_s0 = inlined_call_operand.hbm [shape: bf16[16,32], index: 0, kind: input, shape index: {}]   ;;  %s783_s1 = inlined_call_operand.hbm [shape: bf16[32,128], index: 1, kind: input, shape index: {}]   ;;  %s784_s2 = inlined_call_operand.hbm [shape: bf16[32,128], index: 2, kind: input, shape index: {}]   ;;  %s785_s3 = inlined_call_operand.hbm [shape: bf16[128,128], index: 3, kind: input, shape index: {}]   ;;  %s786_s4 = inlined_call_operand.hbm [shape: bf16[128,128], index: 4, kind: input, shape index: {}]   ;;  %s787_s5 = inlined_call_operand.vmem [shape: f32[1,128], index: 5, kind: input, shape index: {}]   ;;  %s788_s6 = inlined_call_operand.hbm [shape: bf16[16,128], index: 6, kind: output, shape index: {}]  }
   0x1   :  { %12 = vsyncpa [#allocation7], 0 }
   0x2   :  { %13 = vsyncpa [#allocation10], 0 }
   0x3   :  { %14 = vsyncpa [#allocation5], 0  ;;  %s695_s21 = smov [#allocation6]   ;;  %s696_s23 = smov [#allocation9]  }
   0x4   :  { %s32_s22 = sshll.u32 %s695_s21, 4  ;;  %s56_s24 = sshll.u32 %s696_s23, 4  ;;  %s33_s22 = int_to_ptr.vmem [resolvable:$true] %s32_s22  ;;  %s57_s24 = int_to_ptr.vmem [resolvable:$true] %s56_s24 }
   0x5   :  { %s575_s25 = scalar_lea.vmem %s33_s22, 256  ;;  %p580_p1 = scmp.lt.s32.totalorder %s33_s22, %s33_s22 }
   0x6   :  { %p576_p0 = scmp.ne.s32.totalorder %s33_s22, %s575_s25  ;;  %p581_p2 = scmp.lt.s32.totalorder %s575_s25, %s575_s25 }
   0x8   :  { %p582_p3 = por %p581_p2, %p580_p1 }
   0xa   :  { %p583_p4 = pnand %p582_p3, %p576_p0 }
   0xc   :  { %586 = shalt.err (!%p583_p4)
}
   0xd   :  { %s697_s26 = smov 64   ;;  %s698_s27 = smov 4  }
   0xe   :  { %38 = dma.hbm_to_vmem [thread:$0]  %s783_s1, 256, %s33_s22, [#allocation7], %s697_s26, %s697_s26, %s698_s27  }
   0xf   :  { %s595_s30 = scalar_lea.vmem %s57_s24, 1024  ;;  %p600_p6 = scmp.lt.s32.totalorder %s57_s24, %s57_s24 }
  0x10   :  { %p596_p5 = scmp.ne.s32.totalorder %s57_s24, %s595_s30  ;;  %p601_p7 = scmp.lt.s32.totalorder %s595_s30, %s595_s30 }
  0x12   :  { %p602_p8 = por %p601_p7, %p600_p6 }
  0x14   :  { %p603_p9 = pnand %p602_p8, %p596_p5 }
  0x16   :  { %606 = shalt.err (!%p603_p9)
}
  0x17   :  { %62 = dma.hbm_to_vmem [thread:$0]  %s785_s3, 1024, %s57_s24, [#allocation10], %s697_s26, %s697_s26, %s698_s27  }
  0x18   :  { %s699_s9 = smov [#allocation3]   ;;  %s700_s11 = smov [#allocation8]  }
  0x19   :  { %s20_s10 = sshll.u32 %s699_s9, 4  ;;  %s44_s12 = sshll.u32 %s700_s11, 4  ;;  %s21_s10 = int_to_ptr.vmem [resolvable:$true] %s20_s10  ;;  %s45_s12 = int_to_ptr.vmem [resolvable:$true] %s44_s12 }
  0x1a   :  { %s615_s1 = scalar_lea.vmem %s21_s10, 128  ;;  %p620_p11 = scmp.lt.s32.totalorder %s21_s10, %s21_s10 }
  0x1b   :  { %p616_p10 = scmp.ne.s32.totalorder %s21_s10, %s615_s1  ;;  %p621_p12 = scmp.lt.s32.totalorder %s615_s1, %s615_s1 }
  0x1d   :  { %p622_p13 = por %p621_p12, %p620_p11 }
  0x1f   :  { %p623_p0 = pnand %p622_p13, %p616_p10 }
  0x21   :  { %626 = shalt.err (!%p623_p0)
}
  0x22   :  { %26 = dma.hbm_to_vmem [thread:$0]  %s782_s0, 128, %s21_s10, [#allocation4], %s697_s26, %s697_s26, %s698_s27  }
  0x23   :  { %s635_s3 = scalar_lea.vmem %s45_s12, 128  ;;  %p640_p2 = scmp.lt.s32.totalorder %s45_s12, %s45_s12 }
  0x24   :  { %p636_p1 = scmp.ne.s32.totalorder %s45_s12, %s635_s3  ;;  %p641_p3 = scmp.lt.s32.totalorder %s635_s3, %s635_s3 }
  0x26   :  { %p642_p4 = por %p641_p3, %p640_p2 }
  0x28   :  { %p643_p5 = pnand %p642_p4, %p636_p1 }
  0x2a   :  { %646 = shalt.err (!%p643_p5)
}
  0x2b   :  { %50 = dma.hbm_to_vmem [thread:$0]  %s784_s2, 128, %s45_s12, [#allocation7], %s697_s26, %s697_s26, %s698_s27  }
  0x2c   :  { %s701_s17 = smov [#allocation11]  }
  0x2d   :  { %s68_s18 = sshll.u32 %s701_s17, 4  ;;  %s69_s18 = int_to_ptr.vmem [resolvable:$true] %s68_s18 }
  0x2e   :  { %s655_s19 = scalar_lea.vmem %s69_s18, 1024  ;;  %p660_p7 = scmp.lt.s32.totalorder %s69_s18, %s69_s18 }
  0x2f   :  { %p656_p6 = scmp.ne.s32.totalorder %s69_s18, %s655_s19  ;;  %p661_p8 = scmp.lt.s32.totalorder %s655_s19, %s655_s19 }
  0x31   :  { %p662_p9 = por %p661_p8, %p660_p7 }
  0x33   :  { %p663_p10 = pnand %p662_p9, %p656_p6 }
  0x35   :  { %666 = shalt.err (!%p663_p10)
}
  0x36   :  { %74 = dma.hbm_to_vmem [thread:$0]  %s786_s4, 1024, %s69_s18, [#allocation10], %s697_s26, %s697_s26, %s698_s27  }
  0x37   :  { %687 = dma.done.wait [#allocation4], 128  }
  0x38   :  { %688 = vsyncadd [#allocation4], 4294967168 }
  0x39   :  { %689 = dma.done.wait [#allocation7], 384  }
  0x3a   :  { %690 = vsyncadd [#allocation7], 4294966912 }
  0x3b   :  { %691 = dma.done.wait [#allocation10], 2048  }
  0x3c   :  { %692 = vsyncadd [#allocation10], 4294965248  ;;  %v702_v0 = vmov 0.0   ;;  %vm703_vm0 = vmmov 0   ;;  %v547_v1 = vld [vmem:[#allocation6 + $0x8] sm:$0xff]   ;;  %v548_v2 = vld [vmem:[#allocation6] sm:$0xff]  }
  0x3d   :  { %489 = vmatprep.subr.bf16.mxu0 %v702_v0  ;;  %493 = vmatprep.mubr.msk.bf16.mxu0 %vm703_vm0, %v702_v0  ;;  %v549_v3 = vld [vmem:[#allocation3] sm:$0xff]   ;;  %v552_v4 = vld [vmem:[#allocation11 + $0x38] sm:$0xff]   ;;  %vm124_vm1 = vcmask 261120   ;;  %v554_v6 = vld [vmem:[#allocation11 + $0x30] sm:$0xff]   ;;  %s704_s21 = smov [#allocation12]  }
  0x3e   :  { %497 = vmatprep.subr.bf16.mxu1 %v702_v0  ;;  %513 = vmatprep.mubr.msk.bf16.mxu1 %vm703_vm0, %v702_v0  ;;  %v550_v5 = vld [vmem:[#allocation9 + $0x38] sm:$0xff]   ;;  %v551_v7 = vld [vmem:[#allocation9 + $0x30] sm:$0xff]   ;;  %v556_v8 = vld [vmem:[#allocation11 + $0x28] sm:$0xff]   ;;  %s423_s22 = sshll.u32 %s704_s21, 4  ;;  %s424_s22 = int_to_ptr.vmem [resolvable:$true] %s423_s22 }
  0x3f   :  { %490 = vmatpush3.bf16.msra.mxu0 %v547_v1  ;;  %498 = vmatpush3.bf16.msra.mxu1 %v552_v4  ;;  %v553_v9 = vld [vmem:[#allocation9 + $0x28] sm:$0xff]   ;;  %v558_v10 = vld [vmem:[#allocation11 + $0x20] sm:$0xff]   ;;  %v560_v12 = vld [vmem:[#allocation11 + $0x18] sm:$0xff]   ;;  %s667_s23 = scalar_lea.vmem %s424_s22, 128  ;;  %p672_p12 = scmp.lt.s32.totalorder %s424_s22, %s424_s22 }
  0x40   :  { %491 = vmatprep.subr.bf16.mxu0 %v702_v0  ;;  %499 = vmatprep.subr.bf16.mxu1 %v702_v0  ;;  %v555_v11 = vld [vmem:[#allocation9 + $0x20] sm:$0xff]   ;;  %v557_v13 = vld [vmem:[#allocation9 + $0x18] sm:$0xff]   ;;  %v562_v14 = vld [vmem:[#allocation11 + $0x10] sm:$0xff]   ;;  %p668_p11 = scmp.ne.s32.totalorder %s424_s22, %s667_s23  ;;  %p673_p13 = scmp.lt.s32.totalorder %s667_s23, %s667_s23 }
  0x41   :  { %v559_v15 = vld [vmem:[#allocation9 + $0x10] sm:$0xff]   ;;  %v561_v16 = vld [vmem:[#allocation9 + $0x8] sm:$0xff]   ;;  %v563_v17 = vld [vmem:[#allocation9] sm:$0xff]  }
  0x42   :  { %v564_v18 = vld [vmem:[#allocation11 + $0x8] sm:$0xff]   ;;  %v565_v19 = vld [vmem:[#allocation8] sm:$0xff]   ;;  %v566_v20 = vld [vmem:[#allocation11] sm:$0xff]   ;;  %p674_p0 = por %p673_p13, %p672_p12 }
  0x43   :  { %492 = vmatpush3.bf16.msra.mxu0 %v548_v2  ;;  %500 = vmatpush3.bf16.msra.mxu1 %v554_v6  ;;  %v458_v32 = vld [vmem:[%s787_s5] ss:$0 sm:$0xff] }
  0x44   :  { %517 = vmatprep.subr.bf16.mxu0 %v702_v0  ;;  %501 = vmatprep.subr.bf16.mxu1 %v702_v0  ;;  %p675_p1 = pnand %p674_p0, %p668_p11 }
  0x46   :  { %494 = vmatmul.mubr.msk.bf16.vlgmr.msra.gmra.mxu0 %vm124_vm1, %v549_v3 }
  0x47   :  { %518 = vmatpush3.bf16.msra.mxu0 %v550_v5  ;;  %533 = vmatprep.mubr.msk.bf16.mxu0 %vm703_vm0, %v702_v0 }
  0x48   :  { %519 = vmatprep.subr.bf16.mxu0 %v702_v0  ;;  %502 = vmatpush3.bf16.msra.mxu1 %v556_v8 }
  0x49   :  { %503 = vmatprep.subr.bf16.mxu1 %v702_v0 }
  0x4b   :  { %520 = vmatpush3.bf16.msra.mxu0 %v551_v7 }
  0x4c   :  { %521 = vmatprep.subr.bf16.mxu0 %v702_v0  ;;  %504 = vmatpush3.bf16.msra.mxu1 %v558_v10 }
  0x4d   :  { %505 = vmatprep.subr.bf16.mxu1 %v702_v0 }
  0x4f   :  { %522 = vmatpush3.bf16.msra.mxu0 %v553_v9 }
  0x50   :  { %523 = vmatprep.subr.bf16.mxu0 %v702_v0  ;;  %506 = vmatpush3.bf16.msra.mxu1 %v560_v12 }
  0x51   :  { %507 = vmatprep.subr.bf16.mxu1 %v702_v0 }
  0x53   :  { %524 = vmatpush3.bf16.msra.mxu0 %v555_v11 }
  0x54   :  { %525 = vmatprep.subr.bf16.mxu0 %v702_v0  ;;  %508 = vmatpush3.bf16.msra.mxu1 %v562_v14 }
  0x55   :  { %509 = vmatprep.subr.bf16.mxu1 %v702_v0 }
  0x57   :  { %526 = vmatpush3.bf16.msra.mxu0 %v557_v13 }
  0x58   :  { %527 = vmatprep.subr.bf16.mxu0 %v702_v0  ;;  %510 = vmatpush3.bf16.msra.mxu1 %v564_v18 }
  0x59   :  { %511 = vmatprep.subr.bf16.mxu1 %v702_v0 }
  0x5b   :  { %528 = vmatpush3.bf16.msra.mxu0 %v559_v15 }
  0x5c   :  { %529 = vmatprep.subr.bf16.mxu0 %v702_v0  ;;  %512 = vmatpush3.bf16.msra.mxu1 %v566_v20 }
  0x5f   :  { %530 = vmatpush3.bf16.msra.mxu0 %v561_v16 }
  0x60   :  { %531 = vmatprep.subr.bf16.mxu0 %v702_v0 }
  0x63   :  { %532 = vmatpush3.bf16.msra.mxu0 %v563_v17 }
  0x66   :  { %534 = vmatmul.mubr.bf16.vlgmr.msra.gmra.mxu0 %v565_v19 }
 0x106   :  { %v162_v21 = vpop.f32.mrf.mxu0 }
 0x108   :  { %v495_v22 = vpop.f32.mrf.mxu0 }
 0x10a   :  { %v165_v23 = vpop.f32.mrf.mxu0 }
 0x10b   :  { %v178_v24 = vpack.c.bf16 %v165_v23, %v162_v21 }
 0x10c   :  { %v496_v25 = vpop.f32.mrf.mxu0 }
 0x10d   :  { %514 = vmatmul.mubr.bf16.vlgmr.msra.gmra.mxu1 %v178_v24 }
 0x126   :  { %v390_v26 = vpop.f32.mrf.mxu0 }
 0x128   :  { %v535_v27 = vpop.f32.mrf.mxu0 }
 0x12a   :  { %v393_v28 = vpop.f32.mrf.mxu0 }
 0x12c   :  { %v536_v29 = vpop.f32.mrf.mxu0 }
 0x1cd   :  { %v277_v30 = vpop.f32.mrf.mxu1 }
 0x1ce   :  { %v391_v31 = vadd.f32 %v390_v26, %v277_v30 }
 0x1cf   :  { %v515_v33 = vpop.f32.mrf.mxu1 }
 0x1d0   :  { %v404_v35 = vadd.f32 %v458_v32, %v391_v31 }
 0x1d1   :  { %v280_v34 = vpop.f32.mrf.mxu1 }
 0x1d2   :  { %v394_v36 = vadd.f32 %v393_v28, %v280_v34  ;;  %v406_v39 = vmax.f32 %v404_v35, 0.0 }
 0x1d3   :  { %v516_v37 = vpop.f32.mrf.mxu1 }
 0x1d4   :  { %v405_v38 = vadd.f32 %v458_v32, %v394_v36 }
 0x1d6   :  { %v407_v40 = vmax.f32 %v405_v38, 0.0 }
 0x1d8   :  { %v466_v41 = vpack.c.bf16 %v407_v40, %v406_v39 }
 0x1da   :  { %467 = vst [vmem:[#allocation12] sm:$0xff] %v466_v41  }
 0x1db   :  { %678 = shalt.err (!%p675_p1)
}
 0x1dc   :  { %429 = dma.vmem_to_hbm [thread:$0]  %s424_s22, 128, %s788_s6, [#allocation5], %s697_s26, %s697_s26, %s698_s27  }
 0x1dd   :  { %693 = dma.done.wait [#allocation5], 128  }
 0x1de   :  { %694 = vsyncadd [#allocation5], 4294967168 }
 0x1df   :  { %433 = vsyncpa [#allocation4], 1 }
 0x1e0   :  { %434 = vsyncpa [#allocation7], 1 }
 0x1e1   :  { %435 = vsyncpa [#allocation10], 1 }
 0x1e2   :  { %436 = vsyncpa [#allocation5], 1 }

</bundles_post_ra>
